<compile_context>
chip_gen: v5e
topology: v5e:2x2
jax: 0.10.0
libtpu: 0.0.40
codegen_flags: <defaults>
</compile_context>

<pallas_src>
from functools import partial

import jax
import jax.numpy as jnp
import numpy as np
from jax.experimental import pallas as pl
from jax.experimental.pallas import tpu as pltpu


def _round_up(x, m):
    return (x + m - 1) // m * m


# ----------------------------------------------------------------------------
# Kernel 1: linear layer  y = x @ W + b
# ----------------------------------------------------------------------------
def _linear_kernel_single_k(x_ref, w_ref, b_ref, o_ref):
    # fp32->bf16 activation cast fused here (VPU) instead of a separate
    # XLA pass over x in HBM; fp32 accumulation on the MXU.
    acc = jnp.dot(x_ref[...].astype(w_ref.dtype), w_ref[...],
                  preferred_element_type=jnp.float32)
    o_ref[...] = (acc + b_ref[...].astype(jnp.float32)).astype(o_ref.dtype)


def _linear_kernel_k_tiled(x_ref, w_ref, b_ref, o_ref, acc_ref):
    @pl.when(pl.program_id(2) == 0)
    def _():
        acc_ref[...] = jnp.zeros_like(acc_ref)

    acc_ref[...] += jnp.dot(x_ref[...].astype(w_ref.dtype), w_ref[...],
                            preferred_element_type=jnp.float32)

    @pl.when(pl.program_id(2) == pl.num_programs(2) - 1)
    def _():
        o_ref[...] = (acc_ref[...] + b_ref[...].astype(jnp.float32)).astype(
            o_ref.dtype)


def pallas_linear(x, w, b, *, out_dtype=None, max_tm=512, max_tn=768,
                  max_tk=2048, vmem_limit_bytes=48 * 1024 * 1024):
    """y = x @ w + b.   x: (M, K), w: (K, N), b: (1, N).

    Tile selection (perf-review driven):
      * tk = K whenever K <= max_tk -> no reduction grid axis, no fp32
        accumulator, zero K padding (ViT K=768 always takes this path).
      * tn = N if N <= max_tn, else the largest 128-multiple <= max_tn that
        divides N (768 divides both 768 and 2304 -> zero N padding for ViT).
      * tm = min(max_tm, round_up(M, 8)) so small-M calls use one M step.
    Defaults keep the double-buffered working set ~9 MiB (safe on v7x's
    64 MiB VMEM); v5e/v6e (128 MiB) can raise max_tm/max_tn for more reuse.
    """
    M, K = x.shape
    K2, N = w.shape
    assert K == K2 and b.shape == (1, N)
    out_dtype = out_dtype or x.dtype
    isz_in = int(np.dtype(x.dtype).itemsize)
    isz_w = int(np.dtype(w.dtype).itemsize)
    isz_out = int(np.dtype(out_dtype).itemsize)

    # ---- N tile: full if small, else a 128-multiple divisor of N ----
    if N <= max_tn:
        tn = N
    else:
        tn = 0
        t = (max_tn // 128) * 128
        while t >= 128:
            if N % t == 0:
                tn = t
                break
            t -= 128
        if tn == 0:                       # no divisor found -> pad N (rare)
            tn = (max_tn // 128) * 128
    Np = _round_up(N, tn)

    # ---- M tile ----
    tm = min(max_tm, _round_up(M, 8))
    Mp = _round_up(M, tm)

    wp, bp = w, b
    if Np != N:
        wp = jnp.pad(w, ((0, 0), (0, Np - N)))
        bp = jnp.pad(b, ((0, 0), (0, Np - N)))

    if K <= max_tk:
        # ---- single-K-block path: no reduction axis, no accumulator ----
        xp = x if Mp == M else jnp.pad(x, ((0, Mp - M), (0, 0)))
        out = pl.pallas_call(
            _linear_kernel_single_k,
            out_shape=jax.ShapeDtypeStruct((Mp, Np), out_dtype),
            grid=(Mp // tm, Np // tn),
            in_specs=[
                pl.BlockSpec((tm, K), lambda i, j: (i, 0)),
                pl.BlockSpec((K, tn), lambda i, j: (0, j)),
                pl.BlockSpec((1, tn), lambda i, j: (0, j)),
            ],
            out_specs=pl.BlockSpec((tm, tn), lambda i, j: (i, j)),
            compiler_params=pltpu.CompilerParams(
                dimension_semantics=("parallel", "parallel"),
                vmem_limit_bytes=vmem_limit_bytes,
            ),
            cost_estimate=pl.CostEstimate(
                flops=2 * Mp * Np * K,
                transcendentals=0,
                bytes_accessed=Mp * K * isz_in + K * Np * isz_w
                + Mp * Np * isz_out,
            ),
        )(xp, wp, bp)
    else:
        # ---- K-tiled fallback (K > max_tk): fp32 VMEM accumulator ----
        tk = min(max_tk, _round_up(K, 128))
        Kp = _round_up(K, tk)
        xp = x
        if Mp != M or Kp != K:
            xp = jnp.pad(x, ((0, Mp - M), (0, Kp - K)))
        if Kp != K:
            wp = jnp.pad(wp, ((0, Kp - K), (0, 0)))
        # TODO(synk): if the weight DMA shows up exposed in a trace, bump the w
        # BlockSpec to pipeline_mode=pl.Buffered(3).
        out = pl.pallas_call(
            _linear_kernel_k_tiled,
            out_shape=jax.ShapeDtypeStruct((Mp, Np), out_dtype),
            grid=(Mp // tm, Np // tn, Kp // tk),
            in_specs=[
                pl.BlockSpec((tm, tk), lambda i, j, k: (i, k)),
                pl.BlockSpec((tk, tn), lambda i, j, k: (k, j)),
                pl.BlockSpec((1, tn), lambda i, j, k: (0, j)),
            ],
            out_specs=pl.BlockSpec((tm, tn), lambda i, j, k: (i, j)),
            scratch_shapes=[pltpu.VMEM((tm, tn), jnp.float32)],
            compiler_params=pltpu.CompilerParams(
                dimension_semantics=("parallel", "parallel", "arbitrary"),
                vmem_limit_bytes=vmem_limit_bytes,
            ),
            cost_estimate=pl.CostEstimate(
                flops=2 * Mp * Np * Kp,
                transcendentals=0,
                bytes_accessed=Mp * Kp * isz_in + Kp * Np * isz_w
                + Mp * Np * isz_out,
            ),
        )(xp, wp, bp)

    if Mp != M or Np != N:
        out = out[:M, :N]
    return out


# ----------------------------------------------------------------------------
# Kernel 2: multi-head attention on the raw (B, N, 3C) qkv projection.
# ----------------------------------------------------------------------------
def _prefer_bf16_exp():
    """bf16 EUP exists on v6e/v7x; keep exp in fp32 on older generations."""
    try:
        kind = jax.devices()[0].device_kind.lower()
    except Exception:
        return False
    return ("v6" in kind) or ("v7" in kind)


def _one_head_attention(q, k, v, scale, bf16_exp):
    """softmax(q @ k^T * scale) @ v for one head.  q/k/v: (N, D) bf16."""
    s = jax.lax.dot_general(q, k, (((1,), (1,)), ((), ())),
                            preferred_element_type=jnp.float32)
    s = s * scale                                   # scale fp32 scores (torch parity)
    s = s - jnp.max(s, axis=-1, keepdims=True)
    if bf16_exp:
        p = jnp.exp(s.astype(jnp.bfloat16))         # bf16 EUP on v6e/v7x
        denom = jnp.sum(p, axis=-1, keepdims=True, dtype=jnp.float32)
    else:
        p32 = jnp.exp(s)                            # fp32 exp (v5e and older)
        denom = jnp.sum(p32, axis=-1, keepdims=True)
        p = p32
    o = jnp.dot(p.astype(v.dtype), v, preferred_element_type=jnp.float32)
    return o / denom                                # exact divide on (N, D)


def _attn_grouped_kernel(q_ref, k_ref, v_ref, o_ref, *, heads_per_step,
                         head_dim, scale, bf16_exp):
    # q_ref/k_ref/v_ref/o_ref: (1, N, heads_per_step*head_dim) windows of the
    # (B, N, 3C) qkv tensor / (B, N, C) output.  heads_per_step*head_dim = 128
    # -> unmasked lane-dense loads/stores; head-merged output order for free.
    for h in range(heads_per_step):                 # static unroll (<= 2)
        sl = slice(h * head_dim, (h + 1) * head_dim)
        o = _one_head_attention(q_ref[0, :, sl], k_ref[0, :, sl],
                                v_ref[0, :, sl], scale, bf16_exp)
        o_ref[0, :, sl] = o.astype(o_ref.dtype)


def _attn_allheads_kernel(qkv_ref, o_ref, *, num_heads, scale, bf16_exp):
    # Fallback: all heads of one batch per step.  Per-head windows are read as
    # ref slices (no full-slab value relayout) and each head's result is stored
    # straight into its output columns (no list + concatenate).
    c = o_ref.shape[2]
    d = c // num_heads
    for h in range(num_heads):                      # static unroll over heads
        q = qkv_ref[0, :, h * d:(h + 1) * d]
        k = qkv_ref[0, :, c + h * d:c + (h + 1) * d]
        v = qkv_ref[0, :, 2 * c + h * d:2 * c + (h + 1) * d]
        o = _one_head_attention(q, k, v, scale, bf16_exp)
        o_ref[0, :, h * d:(h + 1) * d] = o.astype(o_ref.dtype)


def pallas_attention(qkv, *, num_heads, scale, out_dtype=jnp.bfloat16,
                     bf16_exp=None):
    """qkv: (B, N, 3C) laid out as [q | k | v] (PyTorch qkv-Linear order).
    Returns (B, N, C) == (softmax(qk^T*scale) @ v).transpose(1,2).reshape(B,N,C)."""
    B, N, three_c = qkv.shape
    C = three_c // 3
    D = C // num_heads
    if bf16_exp is None:
        bf16_exp = _prefer_bf16_exp()

    cost = pl.CostEstimate(
        flops=4 * B * num_heads * N * N * D,
        transcendentals=B * num_heads * N * N,
        bytes_accessed=B * N * three_c * int(np.dtype(qkv.dtype).itemsize)
        + B * N * C * int(np.dtype(out_dtype).itemsize),
    )

    # TODO(synk): add a flash-style online-softmax key-block loop if sequences
    # much longer than ViT's ~200 tokens are needed; the full (N, N) fp32 score
    # block would otherwise blow v7x's 64 MiB VMEM.

    # Pick heads-per-step so the q/k/v/o block width is exactly 128 lanes.
    hp = 0
    if D % 128 == 0:
        hp = 1
    elif 128 % D == 0 and num_heads % (128 // D) == 0:
        hp = 128 // D

    if hp:
        blk = hp * D                                  # multiple of 128
        grp = num_heads // hp
        cblk = C // blk
        kernel = partial(_attn_grouped_kernel, heads_per_step=hp, head_dim=D,
                         scale=scale, bf16_exp=bf16_exp)
        return pl.pallas_call(
            kernel,
            out_shape=jax.ShapeDtypeStruct((B, N, C), out_dtype),
            grid=(B, grp),
            in_specs=[
                pl.BlockSpec((1, N, blk), lambda b, g: (b, 0, g)),             # q
                pl.BlockSpec((1, N, blk), lambda b, g: (b, 0, cblk + g)),      # k
                pl.BlockSpec((1, N, blk), lambda b, g: (b, 0, 2 * cblk + g)),  # v
            ],
            out_specs=pl.BlockSpec((1, N, blk), lambda b, g: (b, 0, g)),
            compiler_params=pltpu.CompilerParams(
                dimension_semantics=("parallel", "parallel"),
            ),
            cost_estimate=cost,
        )(qkv, qkv, qkv)

    # Fallback for head widths that cannot tile to 128 lanes (tiny test shapes).
    kernel = partial(_attn_allheads_kernel, num_heads=num_heads, scale=scale,
                     bf16_exp=bf16_exp)
    return pl.pallas_call(
        kernel,
        out_shape=jax.ShapeDtypeStruct((B, N, C), out_dtype),
        grid=(B,),
        in_specs=[pl.BlockSpec((1, N, three_c), lambda b: (b, 0, 0))],
        out_specs=pl.BlockSpec((1, N, C), lambda b: (b, 0, 0)),
        compiler_params=pltpu.CompilerParams(dimension_semantics=("parallel",)),
        cost_estimate=cost,
    )(qkv)


# ----------------------------------------------------------------------------
# Module wrapper (parameter setup + cheap reshapes only; no HBM transposes)
# ----------------------------------------------------------------------------
class AttentionPallas:
    """Pallas TPU port of the TransReID ViT `Attention` module (inference).

    attn_drop / proj_drop default to p=0.0 in the original module -> identity.
    """

    def __init__(self, dim, num_heads=8, qkv_bias=False, qk_scale=None, *,
                 key, out_dtype=jnp.float32):
        assert dim % num_heads == 0
        self.dim = dim
        self.num_heads = num_heads
        head_dim = dim // num_heads
        self.scale = qk_scale or head_dim ** (-0.5)
        # NOTE: keep out_dtype=jnp.bfloat16 if the downstream residual/LayerNorm
        # tolerates it -- halves the largest output's HBM writeback.
        self.out_dtype = out_dtype

        k1, k2, k3 = jax.random.split(key, 3)
        # fp32 master weights (nn.Linear semantics, stored transposed: (in, out))
        self.w_qkv = jax.random.normal(k1, (dim, 3 * dim), jnp.float32) * 0.1
        self.b_qkv = (jax.random.normal(k2, (1, 3 * dim), jnp.float32) * 0.1
                      if qkv_bias else jnp.zeros((1, 3 * dim), jnp.float32))
        self.w_proj = jax.random.normal(k3, (dim, dim), jnp.float32) * 0.1
        self.b_proj = jnp.zeros((1, dim), jnp.float32)

        # bf16 weight copies made once (MXU-native operands; fp32 accumulation)
        self.w_qkv_bf16 = self.w_qkv.astype(jnp.bfloat16)
        self.w_proj_bf16 = self.w_proj.astype(jnp.bfloat16)

    def __call__(self, x):
        B, N, C = x.shape
        # qkv projection; fp32->bf16 cast of x happens inside the kernel,
        # output stays bf16 in PyTorch column order [q | k | v].
        qkv = pallas_linear(x.reshape(B * N, C), self.w_qkv_bf16, self.b_qkv,
                            out_dtype=jnp.bfloat16)
        qkv = qkv.reshape(B, N, 3 * C)           # contiguous reshape (free)

        # fused multi-head attention (attn_drop p=0.0 -> identity)
        o = pallas_attention(qkv, num_heads=self.num_heads, scale=self.scale,
                             out_dtype=jnp.bfloat16)

        # output projection (proj_drop p=0.0 -> identity)
        out = pallas_linear(o.reshape(B * N, C), self.w_proj_bf16, self.b_proj,
                            out_dtype=self.out_dtype)
        return out.reshape(B, N, C)


# ----------------------------------------------------------------------------
# Pure-JAX fp32 reference for correctness checks
# ----------------------------------------------------------------------------
def reference(attn, x):
    B, N, C = x.shape
    H = attn.num_heads
    D = C // H
    qkv = x.reshape(B * N, C) @ attn.w_qkv + attn.b_qkv
    qkv = qkv.reshape(B, N, 3, H, D).transpose(2, 0, 3, 1, 4)
    q, k, v = qkv[0], qkv[1], qkv[2]
    s = jnp.einsum("bhnd,bhmd->bhnm", q, k) * attn.scale
    p = jax.nn.softmax(s, axis=-1)
    o = jnp.einsum("bhnm,bhmd->bhnd", p, v)
    o = o.transpose(0, 2, 1, 3).reshape(B * N, C)
    return (o @ attn.w_proj + attn.b_proj).reshape(B, N, C)


if __name__ == "__main__":
    key = jax.random.PRNGKey(0)
    k_p1, k_x1, k_p2, k_x2 = jax.random.split(key, 4)

    # Case 1: tiny dims -> exercises the all-heads-per-batch attention fallback
    # and full-dim (no-padding) linear blocks.
    B, N, C, H = 2, 8, 32, 8                      # head_dim = 4
    attn = AttentionPallas(dim=C, num_heads=H, qkv_bias=True, key=k_p1)
    x = jax.random.normal(k_x1, (B, N, C), jnp.float32)
    out = jax.block_until_ready(attn(x))
    ref = reference(attn, x)
    assert out.shape == (B, N, C)
    np.testing.assert_allclose(np.asarray(out, np.float32),
                               np.asarray(ref, np.float32),
                               atol=1e-2, rtol=5e-2)

    # Case 2: head_dim = 64 -> exercises the (B, H//2) head-grouped attention
    # path (128-lane blocks) and the single-K-block linear path.
    B2, N2, C2, H2 = 2, 16, 256, 4                # head_dim = 64
    attn2 = AttentionPallas(dim=C2, num_heads=H2, qkv_bias=False, key=k_p2)
    x2 = jax.random.normal(k_x2, (B2, N2, C2), jnp.float32)
    out2 = jax.block_until_ready(attn2(x2))
    ref2 = reference(attn2, x2)
    assert out2.shape == (B2, N2, C2)
    np.testing.assert_allclose(np.asarray(out2, np.float32),
                               np.asarray(ref2, np.float32),
                               atol=5e-2, rtol=5e-2)

    print("KERNEL_OK")
</pallas_src>

<mosaic_0001>
module attributes {stable_mosaic.version = 11 : i64} {
  func.func @_linear_kernel_single_k(%arg0: i32, %arg1: i32, %arg2: memref<16x32xf32, #tpu.memory_space<vmem>>, %arg3: memref<32x96xbf16, #tpu.memory_space<vmem>>, %arg4: memref<1x96xf32, #tpu.memory_space<vmem>>, %arg5: memref<16x96xbf16, #tpu.memory_space<vmem>>) attributes {dimension_semantics = [#tpu.dimension_semantics<parallel>, #tpu.dimension_semantics<parallel>], iteration_bounds = array<i64: 1, 1>, scalar_prefetch = 0 : i64, scratch_operands = 0 : i64, tpu.core_type = #tpu.core_type<tc>, window_params = [{transform_indices = @transform_0, window_bounds = array<i64: 16, 32>}, {transform_indices = @transform_1, window_bounds = array<i64: 32, 96>}, {transform_indices = @transform_2, window_bounds = array<i64: 1, 96>}, {transform_indices = @transform_3, window_bounds = array<i64: 16, 96>}]} {
    %c0 = arith.constant 0 : index
    %c0_0 = arith.constant 0 : index
    %0 = vector.load %arg2[%c0, %c0_0] : memref<16x32xf32, #tpu.memory_space<vmem>>, vector<16x32xf32>
    %1 = arith.truncf %0 : vector<16x32xf32> to vector<16x32xbf16>
    %c0_1 = arith.constant 0 : index
    %c0_2 = arith.constant 0 : index
    %2 = vector.load %arg3[%c0_1, %c0_2] : memref<32x96xbf16, #tpu.memory_space<vmem>>, vector<32x96xbf16>
    %cst = arith.constant dense<0.000000e+00> : vector<16x96xf32>
    %3 = tpu.matmul %1, %2, %cst {dimension_numbers = #tpu.dot_dimension_numbers<[1], [0], [0], [1], [0, 0, 1, 1], [], []>} : vector<16x32xbf16>, vector<32x96xbf16>, vector<16x96xf32> -> vector<16x96xf32>
    %c0_3 = arith.constant 0 : index
    %c0_4 = arith.constant 0 : index
    %4 = vector.load %arg4[%c0_3, %c0_4] : memref<1x96xf32, #tpu.memory_space<vmem>>, vector<1x96xf32>
    %5 = vector.broadcast %4 : vector<1x96xf32> to vector<16x96xf32>
    %6 = arith.addf %3, %5 : vector<16x96xf32>
    %7 = arith.truncf %6 : vector<16x96xf32> to vector<16x96xbf16>
    %c0_5 = arith.constant 0 : index
    %c0_6 = arith.constant 0 : index
    %8 = vector.load %arg5[%c0_5, %c0_6] : memref<16x96xbf16, #tpu.memory_space<vmem>>, vector<16x96xbf16>
    tpu.vector_store %arg5[%c0_5, %c0_6], %7 {strides = array<i32>} : memref<16x96xbf16, #tpu.memory_space<vmem>>, vector<16x96xbf16>,
    return
  }
  func.func @transform_0(%arg0: i32, %arg1: i32) -> (i32, i32) {
    %c0_i32 = arith.constant 0 : i32
    %c0_i32_0 = arith.constant 0 : i32
    return %arg0, %c0_i32 : i32, i32
  }
  func.func @transform_1(%arg0: i32, %arg1: i32) -> (i32, i32) {
    %c0_i32 = arith.constant 0 : i32
    %c0_i32_0 = arith.constant 0 : i32
    return %c0_i32, %arg1 : i32, i32
  }
  func.func @transform_2(%arg0: i32, %arg1: i32) -> (i32, i32) {
    %c0_i32 = arith.constant 0 : i32
    %c0_i32_0 = arith.constant 0 : i32
    return %c0_i32, %arg1 : i32, i32
  }
  func.func @transform_3(%arg0: i32, %arg1: i32) -> (i32, i32) {
    %c0_i32 = arith.constant 0 : i32
    return %arg0, %arg1 : i32, i32
  }
}

</mosaic_0001>

<bundles_post_ra>
// kernel: tpu_custom_call.1
= control target key start
LH: loop header
LB: loop body
LE: loop exit
PB: predicated region body
PF: predicated region fallthrough
CT: control target
= control target key end

     0   :  { %8 = vsyncpa [#allocation3], 0  ;;  %s256_s0 = inlined_call_operand.hbm [shape: f32[16,32], index: 0, kind: input, shape index: {}]   ;;  %s257_s1 = inlined_call_operand.hbm [shape: bf16[32,96], index: 1, kind: input, shape index: {}]   ;;  %s258_s2 = inlined_call_operand.vmem [shape: f32[1,96], index: 2, kind: input, shape index: {}]   ;;  %s259_s3 = inlined_call_operand.hbm [shape: bf16[16,96], index: 3, kind: output, shape index: {}]  }
   0x1   :  { %9 = vsyncpa [#allocation6], 0 }
   0x2   :  { %10 = vsyncpa [#allocation4], 0  ;;  %s15_s14 = sshll.u32 %s256_s0, 4  ;;  %s211_s15 = smov [#allocation2]   ;;  %s16_s14 = int_to_ptr.hbm [resolvable:$true] %s15_s14 }
   0x3   :  { %s17_s16 = sshll.u32 %s211_s15, 4  ;;  %s28_s19 = sshll.u32 %s257_s1, 4  ;;  %s18_s16 = int_to_ptr.vmem [resolvable:$true] %s17_s16  ;;  %s29_s19 = int_to_ptr.hbm [resolvable:$true] %s28_s19 }
   0x4   :  { %s212_s20 = smov 128   ;;  %s213_s21 = smov 8  }
   0x5   :  { %23 = dma.hbm_to_vmem [thread:$0]  %s16_s14, 256, %s18_s16, [#allocation3], %s212_s20, %s212_s20, %s213_s21  }
   0x6   :  { %s214_s22 = smov [#allocation5]   ;;  %s215_s24 = smov 64  }
   0x7   :  { %s30_s23 = sshll.u32 %s214_s22, 4  ;;  %s216_s25 = smov 4   ;;  %s31_s23 = int_to_ptr.vmem [resolvable:$true] %s30_s23 }
   0x8   :  { %36 = dma.hbm_to_vmem [thread:$0]  %s29_s19, 256, %s31_s23, [#allocation6], %s215_s24, %s215_s24, %s216_s25  }
   0x9   :  { %205 = dma.done.wait [#allocation3], 256  }
   0xa   :  { %206 = vsyncadd [#allocation3], 4294967040 }
   0xb   :  { %207 = dma.done.wait [#allocation6], 256  }
   0xc   :  { %208 = vsyncadd [#allocation6], 4294967040  ;;  %v124_v0 = vld [vmem:[#allocation5 + $0x8] sm:$0xff]  ;;  %v123_v1 = vld [vmem:[#allocation5] sm:$0xff]  ;;  %vm71_vm0 = vcmask 261120   ;;  %vm91_vm1 = vcmask 781312  }
   0xd   :  { %81 = vmatpush.bf16.msra.mxu0 %v124_v0  ;;  %v48_v2 = vld [vmem:[#allocation2] sm:$0xff]  ;;  %v49_v3 = vld [vmem:[#allocation2 + $0x8] sm:$0xff]  ;;  %s217_s26 = smov [#allocation7]   ;;  %s100_s30 = sshll.u32 %s259_s3, 4  ;;  %s101_s30 = int_to_ptr.hbm [resolvable:$true] %s100_s30 }
   0xe   :  { %v50_v4 = vpack.c.bf16 %v49_v3, %v48_v2  ;;  %v132_v5 = vld [vmem:[%s258_s2] ss:$0 sm:$0xff]  ;;  %s98_s27 = sshll.u32 %s217_s26, 4  ;;  %s99_s27 = int_to_ptr.vmem [resolvable:$true] %s98_s27 }
  0x11   :  { %82 = vmatpush.bf16.msra.mxu0 %v123_v1 }
  0x14   :  { %122 = vmatmul.msk.bf16.vlgmr.msra.gmra.mxu0 %vm71_vm0, %v50_v4 }
  0x91   :  { %v84_v6 = vpop.f32.mrf.mxu0 }
  0x92   :  { %v85_v7 = vadd.f32 %v132_v5, %v84_v6 }
  0x94   :  { %v89_v8 = vpack.c.bf16 %v85_v7, %v85_v7 }
  0x96   :  { %92 = vst.msk [vmem:[#allocation7] sm:$0xf] %vm91_vm1, %v89_v8 }
  0x99   :  { %v86_v9 = vpop.f32.mrf.mxu0 }
  0x9a   :  { %v87_v10 = vadd.f32 %v132_v5, %v86_v9 }
  0x9c   :  { %v90_v11 = vpack.c.bf16 %v87_v10, %v87_v10 }
  0x9e   :  { %93 = vst.msk [vmem:[#allocation7 + $0x4] sm:$0xf] %vm91_vm1, %v90_v11 }
  0x9f   :  { %106 = dma.vmem_to_hbm [thread:$0]  %s99_s27, 128, %s101_s30, [#allocation4], %s215_s24, %s215_s24, %s216_s25  }
  0xa0   :  { %209 = dma.done.wait [#allocation4], 128  }
  0xa1   :  { %210 = vsyncadd [#allocation4], 4294967168 }
  0xa2   :  { %111 = vsyncpa [#allocation3], 1 }
  0xa3   :  { %112 = vsyncpa [#allocation6], 1 }
  0xa4   :  { %113 = vsyncpa [#allocation4], 1 }

</bundles_post_ra>
